<compile_context>
chip_gen: v7x
topology: tpu7x:2x2x1
jax: 0.10.0
libtpu: 0.0.40
codegen_flags: <defaults>
</compile_context>

<pallas_src>
import functools

import jax
import jax.numpy as jnp
import numpy as np
from jax.experimental import pallas as pl
from jax.experimental.pallas import tpu as pltpu


def _round_up(n, m):
    return (n + m - 1) // m * m


def tcrn_kernel(x_ref, h_ref, w_ref, b_ref, logp_ref, hnew_ref, *, TDp, H, O):
    s = pl.program_id(0)

    # Initialise the VMEM-resident carried state from the external h on the
    # first segment.  hnew_ref has a constant-index BlockSpec, so it stays in
    # VMEM across the whole grid and is flushed to HBM once at the end.
    @pl.when(s == 0)
    def _():
        hnew_ref[...] = h_ref[...]

    # ---- static, 8-aligned row offsets into the packed bf16 weight slab ----
    r1 = TDp            # conv rows end (zero-padded past T*D)
    r2 = r1 + 2 * H     # rnnsfc1 rows end
    r3 = r2 + 2 * H     # rnnsfc2 rows end
    r4 = r3 + 2 * H     # rnnsfc3 rows end

    wc = w_ref[0:r1, 0:H]                 # [TDp, H]
    w1x = w_ref[r1:r1 + H, 0:H]           # x-path / h-path halves of W1^T
    w1h = w_ref[r1 + H:r2, 0:H]
    w2x = w_ref[r2:r2 + H, 0:H]
    w2h = w_ref[r2 + H:r3, 0:H]
    w3x = w_ref[r3:r3 + H, 0:H]
    w3h = w_ref[r3 + H:r4, 0:H]
    wfc = w_ref[r4:r4 + H, 0:O]           # [H, O]

    bc = b_ref[0:1, 0:H]                  # f32 biases, one per 8-row group
    b1 = b_ref[8:9, 0:H]
    b2 = b_ref[16:17, 0:H]
    b3 = b_ref[24:25, 0:H]
    bfc = b_ref[32:33, 0:O]

    # ---- temporal conv (full-length kernel) == matmul + bias, then ReLU ----
    x = x_ref[0]                          # [B, TDp] bf16 (pad cols are zero)
    feat = jnp.maximum(
        jnp.dot(x, wc, preferred_element_type=jnp.float32) + bc, 0.0)  # [B,H] f32

    # old hidden states (leading-axis views, f32)
    h0 = hnew_ref[0]
    h1 = hnew_ref[1]
    h2 = hnew_ref[2]

    def layer(xpart, hpart, wx, wh, b):
        # h-path dot does not depend on the previous layer -> off critical path
        acc = jnp.dot(hpart.astype(jnp.bfloat16), wh,
                      preferred_element_type=jnp.float32)
        acc = acc + jnp.dot(xpart.astype(jnp.bfloat16), wx,
                            preferred_element_type=jnp.float32)
        return jnp.maximum(acc + b, 0.0)

    nh0 = layer(feat, h0, w1x, w1h, b1)
    nh1 = layer(nh0, h1, w2x, w2h, b2)
    nh2 = layer(nh1, h2, w3x, w3h, b3)

    # carry the new hidden state (also the final output)
    hnew_ref[0] = nh0
    hnew_ref[1] = nh1
    hnew_ref[2] = nh2

    # ---- fc -> log_softmax (relu(relu(x)) == relu(x), elided) ----
    logits = jnp.dot(nh2.astype(jnp.bfloat16), wfc,
                     preferred_element_type=jnp.float32) + bfc          # [B, O]
    m = jnp.max(logits, axis=-1, keepdims=True)
    sm = logits - m
    lse = jnp.log(jnp.sum(jnp.exp(sm), axis=-1, keepdims=True))
    logp_ref[0] = sm - lse


@functools.partial(jax.jit, static_argnames=("H", "O"))
def tcrn_forward_segments(x_segs, h, w_slab, b_slab, *, H, O):
    """Apply the module forward to S segments in sequence (recurrence in-grid).

    x_segs: [S, B, T, D] f32, h: [3, B, H] f32.
    Returns (log_probs [S, B, O] f32, h_final [3, B, H] f32).
    """
    S, B, T, D = x_segs.shape
    TD = T * D
    TDp = _round_up(TD, 8)

    x_flat = x_segs.reshape(S, B, TD)
    if TDp != TD:
        x_flat = jnp.pad(x_flat, ((0, 0), (0, 0), (0, TDp - TD)))
    x_flat = x_flat.astype(jnp.bfloat16)

    rows, C = w_slab.shape
    brows, _ = b_slab.shape

    kernel = functools.partial(tcrn_kernel, TDp=TDp, H=H, O=O)

    logp, h_final = pl.pallas_call(
        kernel,
        grid=(S,),
        in_specs=[
            pl.BlockSpec((1, B, TDp), lambda s: (s, 0, 0)),     # per-segment x
            pl.BlockSpec((3, B, H), lambda s: (0, 0, 0)),       # initial h
            pl.BlockSpec((rows, C), lambda s: (0, 0)),          # weights (resident)
            pl.BlockSpec((brows, C), lambda s: (0, 0)),         # biases (resident)
        ],
        out_specs=(
            pl.BlockSpec((1, B, O), lambda s: (s, 0, 0)),       # per-segment log-probs
            pl.BlockSpec((3, B, H), lambda s: (0, 0, 0)),       # carried / final h
        ),
        out_shape=(
            jax.ShapeDtypeStruct((S, B, O), jnp.float32),
            jax.ShapeDtypeStruct((3, B, H), jnp.float32),
        ),
        compiler_params=pltpu.CompilerParams(
            dimension_semantics=("arbitrary",)),
    )(x_flat, h, w_slab, b_slab)
    return logp, h_final


def tcrn_forward(x, h, w_slab, b_slab, *, H, O):
    """Exact equivalent of the module's forward: one segment per call.

    x: [B, T, D] f32, h: [3, B, H] f32 -> (log_probs [B, O], hnew [3, B, H]).
    """
    logp, hnew = tcrn_forward_segments(x[None], h, w_slab, b_slab, H=H, O=O)
    return logp[0], hnew


def make_params(key, input_dim, output_dim, hidden_size, frames_per_segment):
    """Deterministic synthetic parameters; returns packed slabs + reference weights."""
    D, O, H, T = input_dim, output_dim, hidden_size, frames_per_segment
    ks = jax.random.split(key, 10)

    # Conv1d weight [H, D, T], bias [H]
    wc_t = jax.random.normal(ks[0], (H, D, T), jnp.float32) * 0.1
    bc = jax.random.normal(ks[1], (H,), jnp.float32) * 0.1

    def linear(kw, kb, out_dim, in_dim):
        W = jax.random.normal(kw, (out_dim, in_dim), jnp.float32) * 0.1
        b = jax.random.normal(kb, (out_dim,), jnp.float32) * 0.1
        return W, b

    W1, b1 = linear(ks[2], ks[3], H, 2 * H)
    W2, b2 = linear(ks[4], ks[5], H, 2 * H)
    W3, b3 = linear(ks[6], ks[7], H, 2 * H)
    Wf, bfc = linear(ks[8], ks[9], O, H)

    TD = T * D
    TDp = _round_up(TD, 8)
    C = max(H, O)
    bf16 = jnp.bfloat16

    # Conv as matmul: W_k[t*D + d, h] = wc_t[h, d, t]  (matches x.reshape(B, T*D))
    wc = jnp.transpose(wc_t, (2, 1, 0)).reshape(TD, H)

    # ---- packed bf16 weight slab: [TDp + 7H, C], 8-aligned row blocks ----
    rows = TDp + 7 * H
    w_slab = jnp.zeros((rows, C), bf16)
    w_slab = w_slab.at[0:TD, 0:H].set(wc.astype(bf16))
    w_slab = w_slab.at[TDp:TDp + 2 * H, 0:H].set(W1.T.astype(bf16))
    w_slab = w_slab.at[TDp + 2 * H:TDp + 4 * H, 0:H].set(W2.T.astype(bf16))
    w_slab = w_slab.at[TDp + 4 * H:TDp + 6 * H, 0:H].set(W3.T.astype(bf16))
    w_slab = w_slab.at[TDp + 6 * H:TDp + 7 * H, 0:O].set(Wf.T.astype(bf16))

    # ---- packed f32 bias slab: one bias per 8-row group ----
    b_slab = jnp.zeros((40, C), jnp.float32)
    b_slab = b_slab.at[0, 0:H].set(bc)
    b_slab = b_slab.at[8, 0:H].set(b1)
    b_slab = b_slab.at[16, 0:H].set(b2)
    b_slab = b_slab.at[24, 0:H].set(b3)
    b_slab = b_slab.at[32, 0:O].set(bfc)

    # bf16-rounded weights for the reference (mirror the kernel's numerics)
    W1T = W1.T.astype(bf16)
    W2T = W2.T.astype(bf16)
    W3T = W3.T.astype(bf16)
    ref = dict(
        wc=wc.astype(bf16), bc=bc,
        W1x=W1T[:H], W1h=W1T[H:], b1=b1,
        W2x=W2T[:H], W2h=W2T[H:], b2=b2,
        W3x=W3T[:H], W3h=W3T[H:], b3=b3,
        Wf=Wf.T.astype(bf16), bfc=bfc,
    )
    return (w_slab, b_slab), ref


def reference_forward(x, h, ref):
    """Pure-JAX single-segment reference mirroring the PyTorch module (eval
    mode) with the kernel's bf16-operand / f32-accumulate dot discipline."""
    def dot(a, w):
        return jnp.dot(a.astype(jnp.bfloat16), w,
                       preferred_element_type=jnp.float32)

    B, T, D = x.shape
    x_flat = x.reshape(B, T * D)
    feat = jax.nn.relu(dot(x_flat, ref["wc"]) + ref["bc"])
    nh0 = jax.nn.relu(dot(feat, ref["W1x"]) + dot(h[0], ref["W1h"]) + ref["b1"])
    nh1 = jax.nn.relu(dot(nh0, ref["W2x"]) + dot(h[1], ref["W2h"]) + ref["b2"])
    nh2 = jax.nn.relu(dot(nh1, ref["W3x"]) + dot(h[2], ref["W3h"]) + ref["b3"])
    logits = dot(nh2, ref["Wf"]) + ref["bfc"]     # relu(relu(x)) == relu(x)
    return jax.nn.log_softmax(logits, axis=-1), jnp.stack([nh0, nh1, nh2], 0)


if __name__ == "__main__":
    # small shapes consistent with the module; B=8 fills the 8 sublanes
    B, T, D, H, O = 8, 3, 4, 32, 8     # batch, frames_per_segment, input_dim, hidden, output_dim
    S = 4                              # segments processed per kernel launch

    key = jax.random.PRNGKey(0)
    kx, kh, kp = jax.random.split(key, 3)
    x_segs = jax.random.normal(kx, (S, B, T, D), jnp.float32)
    h0 = jax.random.normal(kh, (3, B, H), jnp.float32)

    (w_slab, b_slab), ref = make_params(kp, D, O, H, T)

    # multi-segment call: the recurrence runs inside the kernel grid
    logp, h_final = tcrn_forward_segments(x_segs, h0, w_slab, b_slab, H=H, O=O)
    jax.block_until_ready((logp, h_final))

    # reference: loop the (single-segment) module forward over the segments
    h_ref = h0
    logp_refs = []
    for si in range(S):
        lp, h_ref = reference_forward(x_segs[si], h_ref, ref)
        logp_refs.append(lp)
    logp_ref = jnp.stack(logp_refs, 0)

    np.testing.assert_allclose(np.asarray(logp), np.asarray(logp_ref),
                               rtol=2e-3, atol=2e-3)
    np.testing.assert_allclose(np.asarray(h_final), np.asarray(h_ref),
                               rtol=2e-3, atol=2e-3)

    # single-step call matches the module's forward signature exactly (S == 1)
    lp1, hnew1 = tcrn_forward(x_segs[0], h0, w_slab, b_slab, H=H, O=O)
    jax.block_until_ready((lp1, hnew1))
    lp1_ref, hnew1_ref = reference_forward(x_segs[0], h0, ref)
    np.testing.assert_allclose(np.asarray(lp1), np.asarray(lp1_ref),
                               rtol=2e-3, atol=2e-3)
    np.testing.assert_allclose(np.asarray(hnew1), np.asarray(hnew1_ref),
                               rtol=2e-3, atol=2e-3)

    print("KERNEL_OK")
</pallas_src>

<mosaic_0001>
module attributes {stable_mosaic.version = 11 : i64} {
  func.func @tcrn_kernel(%arg0: i32, %arg1: memref<1x8x16xbf16, #tpu.memory_space<vmem>>, %arg2: memref<3x8x32xf32, #tpu.memory_space<vmem>>, %arg3: memref<240x32xbf16, #tpu.memory_space<vmem>>, %arg4: memref<40x32xf32, #tpu.memory_space<vmem>>, %arg5: memref<1x8x8xf32, #tpu.memory_space<vmem>>, %arg6: memref<3x8x32xf32, #tpu.memory_space<vmem>>) attributes {dimension_semantics = [#tpu.dimension_semantics<arbitrary>], iteration_bounds = array<i64: 4>, scalar_prefetch = 0 : i64, scratch_operands = 0 : i64, tpu.core_type = #tpu.core_type<tc>, window_params = [{transform_indices = @transform_0, window_bounds = array<i64: 1, 8, 16>}, {pipeline_mode = #tpu.pipeline_mode<synchronous>, transform_indices = @transform_1, window_bounds = array<i64: 3, 8, 32>}, {pipeline_mode = #tpu.pipeline_mode<synchronous>, transform_indices = @transform_2, window_bounds = array<i64: 240, 32>}, {pipeline_mode = #tpu.pipeline_mode<synchronous>, transform_indices = @transform_3, window_bounds = array<i64: 40, 32>}, {transform_indices = @transform_4, window_bounds = array<i64: 1, 8, 8>}, {pipeline_mode = #tpu.pipeline_mode<synchronous>, transform_indices = @transform_5, window_bounds = array<i64: 3, 8, 32>}]} {
    %c0_i32 = arith.constant 0 : i32
    %0 = arith.cmpi eq, %arg0, %c0_i32 : i32
    %1 = arith.extui %0 : i1 to i32
    %c0_i32_0 = arith.constant 0 : i32
    %2 = arith.cmpi ne, %1, %c0_i32_0 : i32
    scf.if %2 {
      %c0_51 = arith.constant 0 : index
      %c0_52 = arith.constant 0 : index
      %c0_53 = arith.constant 0 : index
      %82 = vector.load %arg2[%c0_51, %c0_52, %c0_53] : memref<3x8x32xf32, #tpu.memory_space<vmem>>, vector<3x8x32xf32>
      %c0_54 = arith.constant 0 : index
      %c0_55 = arith.constant 0 : index
      %c0_56 = arith.constant 0 : index
      %83 = vector.load %arg6[%c0_54, %c0_55, %c0_56] : memref<3x8x32xf32, #tpu.memory_space<vmem>>, vector<3x8x32xf32>
      tpu.vector_store %arg6[%c0_54, %c0_55, %c0_56], %82 {strides = array<i32>} : memref<3x8x32xf32, #tpu.memory_space<vmem>>, vector<3x8x32xf32>,
    } else {
    }
    %c0 = arith.constant 0 : index
    %c0_1 = arith.constant 0 : index
    %3 = vector.load %arg3[%c0, %c0_1] : memref<240x32xbf16, #tpu.memory_space<vmem>>, vector<16x32xbf16>
    %c16 = arith.constant 16 : index
    %c0_2 = arith.constant 0 : index
    %4 = vector.load %arg3[%c16, %c0_2] : memref<240x32xbf16, #tpu.memory_space<vmem>>, vector<32x32xbf16>
    %c48 = arith.constant 48 : index
    %c0_3 = arith.constant 0 : index
    %5 = vector.load %arg3[%c48, %c0_3] : memref<240x32xbf16, #tpu.memory_space<vmem>>, vector<32x32xbf16>
    %c80 = arith.constant 80 : index
    %c0_4 = arith.constant 0 : index
    %6 = vector.load %arg3[%c80, %c0_4] : memref<240x32xbf16, #tpu.memory_space<vmem>>, vector<32x32xbf16>
    %c112 = arith.constant 112 : index
    %c0_5 = arith.constant 0 : index
    %7 = vector.load %arg3[%c112, %c0_5] : memref<240x32xbf16, #tpu.memory_space<vmem>>, vector<32x32xbf16>
    %c144 = arith.constant 144 : index
    %c0_6 = arith.constant 0 : index
    %8 = vector.load %arg3[%c144, %c0_6] : memref<240x32xbf16, #tpu.memory_space<vmem>>, vector<32x32xbf16>
    %c176 = arith.constant 176 : index
    %c0_7 = arith.constant 0 : index
    %9 = vector.load %arg3[%c176, %c0_7] : memref<240x32xbf16, #tpu.memory_space<vmem>>, vector<32x32xbf16>
    %c208 = arith.constant 208 : index
    %c0_8 = arith.constant 0 : index
    %10 = vector.load %arg3[%c208, %c0_8] : memref<240x32xbf16, #tpu.memory_space<vmem>>, vector<32x8xbf16>
    %c0_9 = arith.constant 0 : index
    %c0_10 = arith.constant 0 : index
    %11 = vector.load %arg4[%c0_9, %c0_10] : memref<40x32xf32, #tpu.memory_space<vmem>>, vector<1x32xf32>
    %c8 = arith.constant 8 : index
    %c0_11 = arith.constant 0 : index
    %12 = vector.load %arg4[%c8, %c0_11] : memref<40x32xf32, #tpu.memory_space<vmem>>, vector<1x32xf32>
    %c16_12 = arith.constant 16 : index
    %c0_13 = arith.constant 0 : index
    %13 = vector.load %arg4[%c16_12, %c0_13] : memref<40x32xf32, #tpu.memory_space<vmem>>, vector<1x32xf32>
    %c24 = arith.constant 24 : index
    %c0_14 = arith.constant 0 : index
    %14 = vector.load %arg4[%c24, %c0_14] : memref<40x32xf32, #tpu.memory_space<vmem>>, vector<1x32xf32>
    %c32 = arith.constant 32 : index
    %c0_15 = arith.constant 0 : index
    %15 = vector.load %arg4[%c32, %c0_15] : memref<40x32xf32, #tpu.memory_space<vmem>>, vector<1x8xf32>
    %c0_16 = arith.constant 0 : index
    %c0_17 = arith.constant 0 : index
    %c0_18 = arith.constant 0 : index
    %16 = vector.load %arg1[%c0_16, %c0_17, %c0_18] : memref<1x8x16xbf16, #tpu.memory_space<vmem>>, vector<1x8x16xbf16>
    %17 = vector.shape_cast %16 : vector<1x8x16xbf16> to vector<8x16xbf16>
    %cst = arith.constant dense<0.000000e+00> : vector<8x32xf32>
    %18 = tpu.matmul %17, %3, %cst {dimension_numbers = #tpu.dot_dimension_numbers<[1], [0], [0], [1], [0, 0, 1, 1], [], []>} : vector<8x16xbf16>, vector<16x32xbf16>, vector<8x32xf32> -> vector<8x32xf32>
    %19 = vector.broadcast %11 : vector<1x32xf32> to vector<8x32xf32>
    %20 = arith.addf %18, %19 : vector<8x32xf32>
    %cst_19 = arith.constant 0.000000e+00 : f32
    %21 = vector.broadcast %cst_19 : f32 to vector<8x32xf32>
    %22 = arith.maximumf %20, %21 : vector<8x32xf32>
    %c0_20 = arith.constant 0 : index
    %c0_21 = arith.constant 0 : index
    %c0_22 = arith.constant 0 : index
    %23 = vector.load %arg6[%c0_20, %c0_21, %c0_22] : memref<3x8x32xf32, #tpu.memory_space<vmem>>, vector<1x8x32xf32>
    %24 = vector.shape_cast %23 : vector<1x8x32xf32> to vector<8x32xf32>
    %c1 = arith.constant 1 : index
    %c0_23 = arith.constant 0 : index
    %c0_24 = arith.constant 0 : index
    %25 = vector.load %arg6[%c1, %c0_23, %c0_24] : memref<3x8x32xf32, #tpu.memory_space<vmem>>, vector<1x8x32xf32>
    %26 = vector.shape_cast %25 : vector<1x8x32xf32> to vector<8x32xf32>
    %c2 = arith.constant 2 : index
    %c0_25 = arith.constant 0 : index
    %c0_26 = arith.constant 0 : index
    %27 = vector.load %arg6[%c2, %c0_25, %c0_26] : memref<3x8x32xf32, #tpu.memory_space<vmem>>, vector<1x8x32xf32>
    %28 = vector.shape_cast %27 : vector<1x8x32xf32> to vector<8x32xf32>
    %29 = arith.truncf %24 : vector<8x32xf32> to vector<8x32xbf16>
    %cst_27 = arith.constant dense<0.000000e+00> : vector<8x32xf32>
    %30 = tpu.matmul %29, %5, %cst_27 {dimension_numbers = #tpu.dot_dimension_numbers<[1], [0], [0], [1], [0, 0, 1, 1], [], []>} : vector<8x32xbf16>, vector<32x32xbf16>, vector<8x32xf32> -> vector<8x32xf32>
    %31 = arith.truncf %22 : vector<8x32xf32> to vector<8x32xbf16>
    %cst_28 = arith.constant dense<0.000000e+00> : vector<8x32xf32>
    %32 = tpu.matmul %31, %4, %cst_28 {dimension_numbers = #tpu.dot_dimension_numbers<[1], [0], [0], [1], [0, 0, 1, 1], [], []>} : vector<8x32xbf16>, vector<32x32xbf16>, vector<8x32xf32> -> vector<8x32xf32>
    %33 = arith.addf %30, %32 : vector<8x32xf32>
    %34 = vector.broadcast %12 : vector<1x32xf32> to vector<8x32xf32>
    %35 = arith.addf %33, %34 : vector<8x32xf32>
    %cst_29 = arith.constant 0.000000e+00 : f32
    %36 = vector.broadcast %cst_29 : f32 to vector<8x32xf32>
    %37 = arith.maximumf %35, %36 : vector<8x32xf32>
    %38 = arith.truncf %26 : vector<8x32xf32> to vector<8x32xbf16>
    %cst_30 = arith.constant dense<0.000000e+00> : vector<8x32xf32>
    %39 = tpu.matmul %38, %7, %cst_30 {dimension_numbers = #tpu.dot_dimension_numbers<[1], [0], [0], [1], [0, 0, 1, 1], [], []>} : vector<8x32xbf16>, vector<32x32xbf16>, vector<8x32xf32> -> vector<8x32xf32>
    %40 = arith.truncf %37 : vector<8x32xf32> to vector<8x32xbf16>
    %cst_31 = arith.constant dense<0.000000e+00> : vector<8x32xf32>
    %41 = tpu.matmul %40, %6, %cst_31 {dimension_numbers = #tpu.dot_dimension_numbers<[1], [0], [0], [1], [0, 0, 1, 1], [], []>} : vector<8x32xbf16>, vector<32x32xbf16>, vector<8x32xf32> -> vector<8x32xf32>
    %42 = arith.addf %39, %41 : vector<8x32xf32>
    %43 = vector.broadcast %13 : vector<1x32xf32> to vector<8x32xf32>
    %44 = arith.addf %42, %43 : vector<8x32xf32>
    %cst_32 = arith.constant 0.000000e+00 : f32
    %45 = vector.broadcast %cst_32 : f32 to vector<8x32xf32>
    %46 = arith.maximumf %44, %45 : vector<8x32xf32>
    %47 = arith.truncf %28 : vector<8x32xf32> to vector<8x32xbf16>
    %cst_33 = arith.constant dense<0.000000e+00> : vector<8x32xf32>
    %48 = tpu.matmul %47, %9, %cst_33 {dimension_numbers = #tpu.dot_dimension_numbers<[1], [0], [0], [1], [0, 0, 1, 1], [], []>} : vector<8x32xbf16>, vector<32x32xbf16>, vector<8x32xf32> -> vector<8x32xf32>
    %49 = arith.truncf %46 : vector<8x32xf32> to vector<8x32xbf16>
    %cst_34 = arith.constant dense<0.000000e+00> : vector<8x32xf32>
    %50 = tpu.matmul %49, %8, %cst_34 {dimension_numbers = #tpu.dot_dimension_numbers<[1], [0], [0], [1], [0, 0, 1, 1], [], []>} : vector<8x32xbf16>, vector<32x32xbf16>, vector<8x32xf32> -> vector<8x32xf32>
    %51 = arith.addf %48, %50 : vector<8x32xf32>
    %52 = vector.broadcast %14 : vector<1x32xf32> to vector<8x32xf32>
    %53 = arith.addf %51, %52 : vector<8x32xf32>
    %cst_35 = arith.constant 0.000000e+00 : f32
    %54 = vector.broadcast %cst_35 : f32 to vector<8x32xf32>
    %55 = arith.maximumf %53, %54 : vector<8x32xf32>
    %c0_36 = arith.constant 0 : index
    %c0_37 = arith.constant 0 : index
    %c0_38 = arith.constant 0 : index
    %56 = vector.load %arg6[%c0_36, %c0_37, %c0_38] : memref<3x8x32xf32, #tpu.memory_space<vmem>>, vector<1x8x32xf32>
    %57 = vector.shape_cast %56 : vector<1x8x32xf32> to vector<8x32xf32>
    %58 = vector.shape_cast %37 : vector<8x32xf32> to vector<1x8x32xf32>
    tpu.vector_store %arg6[%c0_36, %c0_37, %c0_38], %58 {strides = array<i32>} : memref<3x8x32xf32, #tpu.memory_space<vmem>>, vector<1x8x32xf32>,
    %c1_39 = arith.constant 1 : index
    %c0_40 = arith.constant 0 : index
    %c0_41 = arith.constant 0 : index
    %59 = vector.load %arg6[%c1_39, %c0_40, %c0_41] : memref<3x8x32xf32, #tpu.memory_space<vmem>>, vector<1x8x32xf32>
    %60 = vector.shape_cast %59 : vector<1x8x32xf32> to vector<8x32xf32>
    %61 = vector.shape_cast %46 : vector<8x32xf32> to vector<1x8x32xf32>
    tpu.vector_store %arg6[%c1_39, %c0_40, %c0_41], %61 {strides = array<i32>} : memref<3x8x32xf32, #tpu.memory_space<vmem>>, vector<1x8x32xf32>,
    %c2_42 = arith.constant 2 : index
    %c0_43 = arith.constant 0 : index
    %c0_44 = arith.constant 0 : index
    %62 = vector.load %arg6[%c2_42, %c0_43, %c0_44] : memref<3x8x32xf32, #tpu.memory_space<vmem>>, vector<1x8x32xf32>
    %63 = vector.shape_cast %62 : vector<1x8x32xf32> to vector<8x32xf32>
    %64 = vector.shape_cast %55 : vector<8x32xf32> to vector<1x8x32xf32>
    tpu.vector_store %arg6[%c2_42, %c0_43, %c0_44], %64 {strides = array<i32>} : memref<3x8x32xf32, #tpu.memory_space<vmem>>, vector<1x8x32xf32>,
    %65 = arith.truncf %55 : vector<8x32xf32> to vector<8x32xbf16>
    %cst_45 = arith.constant dense<0.000000e+00> : vector<8x8xf32>
    %66 = tpu.matmul %65, %10, %cst_45 {dimension_numbers = #tpu.dot_dimension_numbers<[1], [0], [0], [1], [0, 0, 1, 1], [], []>} : vector<8x32xbf16>, vector<32x8xbf16>, vector<8x8xf32> -> vector<8x8xf32>
    %67 = vector.broadcast %15 : vector<1x8xf32> to vector<8x8xf32>
    %68 = arith.addf %66, %67 : vector<8x8xf32>
    %cst_46 = arith.constant dense<0xFF800000> : vector<8xf32>
    %69 = vector.multi_reduction <maximumf>, %68, %cst_46 [1] : vector<8x8xf32> to vector<8xf32>
    %70 = vector.shape_cast %69 : vector<8xf32> to vector<8x1xf32>
    %71 = vector.broadcast %70 : vector<8x1xf32> to vector<8x8xf32>
    %72 = arith.subf %68, %71 : vector<8x8xf32>
    %73 = math.exp %72 : vector<8x8xf32>
    %cst_47 = arith.constant dense<0.000000e+00> : vector<8xf32>
    %74 = vector.multi_reduction <add>, %73, %cst_47 [1] : vector<8x8xf32> to vector<8xf32>
    %75 = vector.shape_cast %74 : vector<8xf32> to vector<8x1xf32>
    %76 = math.log %75 : vector<8x1xf32>
    %77 = vector.broadcast %76 : vector<8x1xf32> to vector<8x8xf32>
    %78 = arith.subf %72, %77 : vector<8x8xf32>
    %c0_48 = arith.constant 0 : index
    %c0_49 = arith.constant 0 : index
    %c0_50 = arith.constant 0 : index
    %79 = vector.load %arg5[%c0_48, %c0_49, %c0_50] : memref<1x8x8xf32, #tpu.memory_space<vmem>>, vector<1x8x8xf32>
    %80 = vector.shape_cast %79 : vector<1x8x8xf32> to vector<8x8xf32>
    %81 = vector.shape_cast %78 : vector<8x8xf32> to vector<1x8x8xf32>
    tpu.vector_store %arg5[%c0_48, %c0_49, %c0_50], %81 {strides = array<i32>} : memref<1x8x8xf32, #tpu.memory_space<vmem>>, vector<1x8x8xf32>,
    return
  }
  func.func @transform_0(%arg0: i32) -> (i32, i32, i32) {
    %c0_i32 = arith.constant 0 : i32
    %c0_i32_0 = arith.constant 0 : i32
    %c0_i32_1 = arith.constant 0 : i32
    return %arg0, %c0_i32, %c0_i32_0 : i32, i32, i32
  }
  func.func @transform_1(%arg0: i32) -> (i32, i32, i32) {
    %c0_i32 = arith.constant 0 : i32
    %c0_i32_0 = arith.constant 0 : i32
    %c0_i32_1 = arith.constant 0 : i32
    %c0_i32_2 = arith.constant 0 : i32
    return %c0_i32, %c0_i32_0, %c0_i32_1 : i32, i32, i32
  }
  func.func @transform_2(%arg0: i32) -> (i32, i32) {
    %c0_i32 = arith.constant 0 : i32
    %c0_i32_0 = arith.constant 0 : i32
    %c0_i32_1 = arith.constant 0 : i32
    return %c0_i32, %c0_i32_0 : i32, i32
  }
  func.func @transform_3(%arg0: i32) -> (i32, i32) {
    %c0_i32 = arith.constant 0 : i32
    %c0_i32_0 = arith.constant 0 : i32
    %c0_i32_1 = arith.constant 0 : i32
    return %c0_i32, %c0_i32_0 : i32, i32
  }
  func.func @transform_4(%arg0: i32) -> (i32, i32, i32) {
    %c0_i32 = arith.constant 0 : i32
    %c0_i32_0 = arith.constant 0 : i32
    %c0_i32_1 = arith.constant 0 : i32
    return %arg0, %c0_i32, %c0_i32_0 : i32, i32, i32
  }
  func.func @transform_5(%arg0: i32) -> (i32, i32, i32) {
    %c0_i32 = arith.constant 0 : i32
    %c0_i32_0 = arith.constant 0 : i32
    %c0_i32_1 = arith.constant 0 : i32
    %c0_i32_2 = arith.constant 0 : i32
    return %c0_i32, %c0_i32_0, %c0_i32_1 : i32, i32, i32
  }
}

</mosaic_0001>

<bundles_post_ra>
// kernel: tcrn_forward_segments.1
= control target key start
LH: loop header
LB: loop body
LE: loop exit
PB: predicated region body
PF: predicated region fallthrough
CT: control target
= control target key end

     0   :  { %11 = vsyncpa [#allocation3], 0  ;;  %s1430_s0 = inlined_call_operand.vmem [shape: bf16[4,8,16], index: 0, kind: input, shape index: {}]   ;;  %s1431_s1 = inlined_call_operand.vmem [shape: f32[3,8,32], index: 1, kind: input, shape index: {}]   ;;  %s1432_s2 = inlined_call_operand.vmem [shape: bf16[240,32], index: 2, kind: input, shape index: {}]   ;;  %s1433_s3 = inlined_call_operand.vmem [shape: f32[40,32], index: 3, kind: input, shape index: {}]   ;;  %s1434_s4 = inlined_call_operand.hbm [shape: f32[4,8,8], index: 4, kind: output, shape index: {0}]   ;;  %s1435_s5 = inlined_call_operand.hbm [shape: f32[3,8,32], index: 5, kind: output, shape index: {1}]  }
   0x1   :  { %13 = vsyncpa [#allocation3 + $0x1], 0 }
   0x2   :  { %14 = vsyncpa [#allocation5], 0  ;;  %s1181_s18 = smov 0   ;;  %s1183_s19 = smov 0  }
   0x3   :  { %s1185_s20 = smov 0   ;;  %s1187_s21 = smov 0  }
   0x4 LB: > { %s1202_s22 = sadd.s32 4294967295, %s1143_s21   ;;  %s856_s23 = sadd.s32 4294967294, %s1143_s21   ;;  %s1143_s21 = sphi %s1187_s21, %s1441_s21   ;;  %s1139_s20 = sphi %s1185_s20, %s1440_s20   ;;  %s1135_s19 = sphi %s1183_s19, %s1439_s19   ;;  %s1131_s18 = sphi %s1181_s18, %s1438_s18  }
   0x5   : > { %s1206_s24 = sadd.s32 1, %s1143_s21   ;;  %s116_s25 = sadd.s32 1, %s1139_s20 }
   0x6   : > { %s113_s26 = ssub.s32 %s1143_s21, %s1206_s24  ;;  %p126_p0 = scmp.ne.s32.totalorder %s1139_s20, %s1135_s19 }
   0x7   : > { %p114_p1 = scmp.eq.s32.totalorder %s113_s26, 0  ;;  %p127_p2 = scmp.eq.s32.totalorder %s1202_s22, 3 }
   0x8   : > { %p132_p3 = scmp.ne.s32.totalorder %s1135_s19, %s1131_s18  ;;  %p133_p4 = scmp.eq.s32.totalorder %s856_s23, 3 }
   0x9   : > { %s1217_s27 = scalar_select %p114_p1, %s1139_s20, %s116_s25  }
   0xa   : > { %p1221_p5 = por %p127_p2, %p126_p0  ;;  %p1225_p6 = por %p133_p4, %p132_p3 }
   0xb   : > { %p859_p7 = scmp.ge.s32.totalorder %s1143_s21, 1  ;;  %p188_p8 = scmp.lt.s32.totalorder %s1143_s21, 5 }
   0xd   : > { %p189_p9 = pnand %p859_p7, %p188_p8 }
   0xe   : > { %s210_s30 = sand.u32 (!%p189_p9), 1, %s1135_s19   ;;  %p215_p10 = scmp.lt.s32.totalorder (!%p189_p9), %s1202_s22, 3 }
   0xf   : > { %192 = sbr.rel (%p189_p9) target bundleno = 1459 (0x5b3), region = 36  ;;  %s1235_s6 = sshll.u32 (!%p189_p9), %s210_s30, 3 }
  0x10   : > { %s212_s12 = scalar_lea.vmem (!%p189_p9), [#allocation2], %s1235_s6  ;;  %p862_p11 = scmp.ne.s32.totalorder (!%p189_p9), %s1202_s22, 0 }
  0x16   : > { %s216_s7 = scalar_select %p215_p10, %s1202_s22, 3 }
  0x17   : > { %223 = sbr.rel (%p862_p11) target bundleno = 30 (0x1e), region = 40  ;;  %v224_v0 = vld [vmem:[%s1431_s1] sm:$0xff] (!%p862_p11)  ;;  %vm227_vm0 = vcmask (!%p862_p11), 261120   ;;  %v225_v1 = vld [vmem:[%s1431_s1 + $0x8] sm:$0xff] (!%p862_p11)  ;;  %v226_v2 = vld [vmem:[%s1431_s1 + $0x10] sm:$0xff] (!%p862_p11) }
  0x18   : > { %s861_s8 = sshll.u32 %s216_s7, 2  ;;  %228 = vst.msk [vmem:[#allocation4] sm:$0xff] (!%p862_p11), %vm227_vm0, %v224_v0  ;;  %229 = vst.msk [vmem:[#allocation4 + $0x8] sm:$0xff] (!%p862_p11), %vm227_vm0, %v225_v1 }
  0x19   : > { %s218_s11 = scalar_lea.vmem %s1430_s0, %s861_s8  ;;  %230 = vst.msk [vmem:[#allocation4 + $0x10] sm:$0xff] (!%p862_p11), %vm227_vm0, %v226_v2 }
  0x1e PF: > { %v1032_v3 = vld [vmem:[%s1432_s2] sm:$0xff]   ;;  %v1145_v4 = vmov 0.0   ;;  %vm1146_vm1 = vmmov 0   ;;  %vm277_vm2 = vcmask 130048   ;;  %v1033_v6 = vld [vmem:[%s1432_s2 + $0x18] sm:$0xff]   ;;  %v1034_v7 = vld [vmem:[%s1432_s2 + $0x8] sm:$0xff]  }
  0x1f   : > { %920 = vmatprep.subr.bf16.mxu0 %v1145_v4  ;;  %v266_v5 = vld [vmem:[%s218_s11] sm:$0xf]  ;;  %926 = vmatprep.subr.bf16.mxu1 %v1145_v4  ;;  %v322_v9 = vld [vmem:[#allocation4] sm:$0xff]  ;;  %vm341_vm3 = vcmask 261120   ;;  %v1037_v12 = vld [vmem:[%s1432_s2 + $0x38] sm:$0xff]   ;;  %vm745_vm4 = vcmask 64512  }
  0x20   : > { %921 = vmatpush3.bf16.msra.mxu0 %v1032_v3  ;;  %922 = vmatprep.mubr.msk.bf16.mxu0 %vm1146_vm1, %v1145_v4  ;;  %v1035_v8 = vld [vmem:[%s1432_s2 + $0x20] sm:$0xff]   ;;  %v1036_v10 = vld [vmem:[%s1432_s2 + $0x10] sm:$0xff]   ;;  %v327_v11 = vpack.c.bf16 %v322_v9, %v322_v9  ;;  %v1038_v25 = vld [vmem:[%s1432_s2 + $0x28] sm:$0xff]   ;;  %s1147_s26 = smov [#allocation4]  }
  0x21   : > { %934 = vmatprep.subr.bf16.mxu0 %v1145_v4  ;;  %930 = vmatprep.mubr.msk.bf16.mxu1 %vm1146_vm1, %v1145_v4  ;;  %v863_v13 = vld [vmem:[%s1433_s3] ss:$0 sm:$0xff]  ;;  %v324_v27 = vld [vmem:[#allocation4 + $0x8] sm:$0xff]  ;;  %v1040_v28 = vld [vmem:[%s1432_s2 + $0x30] sm:$0xff]   ;;  %s783_s7 = sshll.u32 %s1147_s26, 4  ;;  %s784_s7 = int_to_ptr.vmem [resolvable:$true] %s783_s7 }
  0x22   : > { %927 = vmatpush3.bf16.msra.mxu1 %v1034_v7  ;;  %v1039_v26 = vld [vmem:[%s1432_s2 + $0x40] sm:$0xff]   ;;  %v446_v29 = vpack.c.bf16 %v324_v27, %v324_v27  ;;  %v1041_v30 = vld [vmem:[%s1432_s2 + $0x58] sm:$0xff]   ;;  %v872_v31 = vld [vmem:[%s1433_s3 + $0x8] ss:$0 sm:$0xff]  ;;  %s1051_s8 = scalar_lea.vmem %s784_s7, 384  ;;  %p1058_p1 = scmp.lt.s32.totalorder %s784_s7, %s784_s7 }
  0x23   : > { %923 = vmatmul.mubr.msk.bf16.vlgmr.msra.gmra.mrb[0].mxu0 %vm277_vm2, %v266_v5  ;;  %928 = vmatprep.subr.bf16.mxu1 %v1145_v4  ;;  %v1042_v44 = vld [vmem:[%s1432_s2 + $0x48] sm:$0xff]   ;;  %v1043_v45 = vld [vmem:[%s1432_s2 + $0x60] sm:$0xff]   ;;  %v1044_v47 = vld [vmem:[%s1432_s2 + $0x50] sm:$0xff]   ;;  %p1052_p12 = scmp.ne.s32.totalorder %s784_s7, %s1051_s8  ;;  %p1059_p3 = scmp.lt.s32.totalorder %s1051_s8, %s1051_s8 }
  0x24   : > { %935 = vmatpush3.bf16.msra.mxu0 %v1033_v6  ;;  %938 = vmatprep.mubr.msk.bf16.mxu0 %vm1146_vm1, %v1145_v4  ;;  %v326_v46 = vld [vmem:[#allocation4 + $0x10] sm:$0xff]  ;;  %v879_v49 = vld [vmem:[%s1433_s3 + $0x10] ss:$0 sm:$0xff]  ;;  %v1045_v62 = vld [vmem:[%s1432_s2 + $0x68] sm:$0xff]  }
  0x25   : > { %936 = vmatprep.subr.bf16.mxu0 %v1145_v4  ;;  %v564_v48 = vpack.c.bf16 %v326_v46, %v326_v46  ;;  %v1046_v63 = vld [vmem:[%s1432_s2 + $0x70] sm:$0xff]   ;;  %v886_v0 = vld [vmem:[%s1433_s3 + $0x18] ss:$0 sm:$0xff]  ;;  %p1053_p13 = pnand %p1052_p12, %p127_p2  ;;  %p1060_p4 = por %p1059_p3, %p1058_p1 }
  0x26   : > { %929 = vmatpush3.bf16.msra.mxu1 %v1036_v10 }
  0x27   : > { %942 = vmatprep.subr.bf16.mxu1 %v1145_v4  ;;  %p1054_p0 = pneg %p1053_p13 }
  0x28   : > { %937 = vmatpush3.bf16.msra.mxu0 %v1035_v8 }
  0x29   : > { %950 = vmatprep.subr.bf16.mxu0 %v1145_v4  ;;  %p1061_p7 = pnand %p1060_p4, %p1054_p0 }
  0x2b   : > { %939 = vmatmul.mubr.msk.bf16.vlgmr.msra.gmra.mrb[4].mxu0 %vm341_vm3, %v327_v11 }
  0x2c   : > { %954 = vmatprep.mubr.msk.bf16.mxu0 %vm1146_vm1, %v1145_v4  ;;  %951 = vmatpush3.bf16.msra.mxu0 %v1037_v12 }
  0x2d   : > { %952 = vmatprep.subr.bf16.mxu0 %v1145_v4 }
  0x30   : > { %953 = vmatpush3.bf16.msra.mxu0 %v1039_v26 }
  0x31   : > { %966 = vmatprep.subr.bf16.mxu0 %v1145_v4 }
  0x33   : > { %955 = vmatmul.mubr.msk.bf16.vlgmr.msra.gmra.mrb[8].mxu0 %vm341_vm3, %v446_v29 }
  0x34   : > { %970 = vmatprep.mubr.msk.bf16.mxu0 %vm1146_vm1, %v1145_v4  ;;  %967 = vmatpush3.bf16.msra.mxu0 %v1041_v30 }
  0x35   : > { %968 = vmatprep.subr.bf16.mxu0 %v1145_v4 }
  0x38   : > { %969 = vmatpush3.bf16.msra.mxu0 %v1043_v45 }
  0x3b   : > { %971 = vmatmul.mubr.msk.bf16.vlgmr.msra.gmra.mrb[12].mxu0 %vm341_vm3, %v564_v48 }
  0xf6   : > { %v315_v14 = vpop.f32.mrb[0].mxu0 }
  0xf7   : > { %v316_v15 = vadd.f32 %v863_v13, %v315_v14  ;;  %v924_v16 = vpop.f32.mrb[1].mxu0 }
  0xf8   : > { %v318_v17 = vpop.f32.mrb[2].mxu0 }
  0xf9   : > { %v321_v18 = vmax.f32 %v316_v15, 0.0  ;;  %v925_v19 = vpop.f32.mrb[3].mxu0 }
  0xfb   : > { %v328_v20 = vpack.c.bf16 %v321_v18, %v321_v18 }
  0xfd   : > { %931 = vmatmul.mubr.msk.bf16.vlgmr.msra.gmra.mrb[0].mxu1 %vm341_vm3, %v328_v20 }
  0xfe   : > { %946 = vmatprep.mubr.msk.bf16.mxu1 %vm1146_vm1, %v1145_v4  ;;  %v434_v21 = vpop.f32.mrb[4].mxu0  ;;  %943 = vmatpush3.bf16.msra.mxu1 %v1038_v25 }
  0xff   : > { %v940_v22 = vpop.f32.mrb[5].mxu0  ;;  %944 = vmatprep.subr.bf16.mxu1 %v1145_v4 }
 0x100   : > { %v437_v23 = vpop.f32.mrb[6].mxu0 }
 0x101   : > { %v941_v24 = vpop.f32.mrb[7].mxu0 }
 0x102   : > { %945 = vmatpush3.bf16.msra.mxu1 %v1040_v28 }
 0x103   : > { %958 = vmatprep.subr.bf16.mxu1 %v1145_v4 }
 0x106   : > { %v552_v40 = vpop.f32.mrb[8].mxu0 }
 0x107   : > { %v956_v41 = vpop.f32.mrb[9].mxu0 }
 0x108   : > { %v555_v42 = vpop.f32.mrb[10].mxu0 }
 0x109   : > { %v957_v43 = vpop.f32.mrb[11].mxu0 }
 0x10e   : > { %v670_v58 = vpop.f32.mrb[12].mxu0 }
 0x10f   : > { %v972_v59 = vpop.f32.mrb[13].mxu0 }
 0x110   : > { %v673_v60 = vpop.f32.mrb[14].mxu0 }
 0x111   : > { %v973_v61 = vpop.f32.mrb[15].mxu0 }
 0x1d0   : > { %v379_v32 = vpop.f32.mrb[0].mxu1 }
 0x1d1   : > { %v435_v33 = vadd.f32 %v434_v21, %v379_v32  ;;  %v932_v34 = vpop.f32.mrb[1].mxu1 }
 0x1d2   : > { %v382_v35 = vpop.f32.mrb[2].mxu1 }
 0x1d3   : > { %v444_v36 = vadd.f32 %v872_v31, %v435_v33  ;;  %v933_v37 = vpop.f32.mrb[3].mxu1 }
 0x1d5   : > { %v445_v38 = vmax.f32 %v444_v36, 0.0 }
 0x1d7   : > { %v447_v39 = vpack.c.bf16 %v445_v38, %v445_v38  ;;  %682 = vst.msk [vmem:[#allocation4] sm:$0xff] %vm341_vm3, %v445_v38 }
 0x1d9   : > { %947 = vmatmul.mubr.msk.bf16.vlgmr.msra.gmra.mrb[4].mxu1 %vm341_vm3, %v447_v39 }
 0x1da   : > { %962 = vmatprep.mubr.msk.bf16.mxu1 %vm1146_vm1, %v1145_v4  ;;  %959 = vmatpush3.bf16.msra.mxu1 %v1042_v44 }
 0x1db   : > { %960 = vmatprep.subr.bf16.mxu1 %v1145_v4 }
 0x1de   : > { %961 = vmatpush3.bf16.msra.mxu1 %v1044_v47 }
 0x1df   : > { %974 = vmatprep.subr.bf16.mxu1 %v1145_v4 }
 0x2ac   : > { %v497_v50 = vpop.f32.mrb[4].mxu1 }
 0x2ad   : > { %v553_v51 = vadd.f32 %v552_v40, %v497_v50  ;;  %v948_v52 = vpop.f32.mrb[5].mxu1 }
 0x2ae   : > { %v500_v53 = vpop.f32.mrb[6].mxu1 }
 0x2af   : > { %v562_v54 = vadd.f32 %v879_v49, %v553_v51  ;;  %v949_v55 = vpop.f32.mrb[7].mxu1 }
 0x2b1   : > { %v563_v56 = vmax.f32 %v562_v54, 0.0 }
 0x2b3   : > { %v565_v57 = vpack.c.bf16 %v563_v56, %v563_v56  ;;  %683 = vst.msk [vmem:[#allocation4 + $0x8] sm:$0xff] %vm341_vm3, %v563_v56 }
 0x2b5   : > { %963 = vmatmul.mubr.msk.bf16.vlgmr.msra.gmra.mrb[8].mxu1 %vm341_vm3, %v565_v57 }
 0x2b6   : > { %978 = vmatprep.mubr.msk.bf16.mxu1 %vm1146_vm1, %v1145_v4  ;;  %975 = vmatpush3.bf16.msra.mxu1 %v1045_v62 }
 0x2b7   : > { %976 = vmatprep.subr.bf16.mxu1 %v1145_v4  ;;  %v887_v4 = vld [vmem:[%s1433_s3 + $0x20] ss:$0 sm:$0xff] }
 0x2ba   : > { %977 = vmatpush3.bf16.msra.mxu1 %v1046_v63 }
 0x388   : > { %v615_v1 = vpop.f32.mrb[8].mxu1 }
 0x389   : > { %v671_v2 = vadd.f32 %v670_v58, %v615_v1  ;;  %v964_v3 = vpop.f32.mrb[9].mxu1 }
 0x38a   : > { %v618_v5 = vpop.f32.mrb[10].mxu1 }
 0x38b   : > { %v680_v6 = vadd.f32 %v886_v0, %v671_v2  ;;  %v965_v7 = vpop.f32.mrb[11].mxu1 }
 0x38d   : > { %v681_v8 = vmax.f32 %v680_v6, 0.0 }
 0x38f   : > { %684 = vst.msk [vmem:[#allocation4 + $0x10] sm:$0xff] %vm341_vm3, %v681_v8  ;;  %v685_v9 = vpack.c.bf16 %v681_v8, %v681_v8 }
 0x391   : > { %979 = vmatmul.mubr.msk.bf16.vlgmr.msra.gmra.mrb[12].mxu1 %vm341_vm3, %v685_v9 }
 0x464   : > { %v739_v10 = vpop.f32.mrb[12].mxu1 }
 0x465   : > { %v740_v11 = vadd.f32 %v887_v4, %v739_v10  ;;  %v980_v12 = vpop.f32.mrb[13].mxu1 }
 0x466   : > { %v742_v13 = vpop.f32.mrb[14].mxu1 }
 0x467   : > { %v981_v14 = vpop.f32.mrb[15].mxu1  ;;  %v746_v15 = vsel %vm745_vm4, %v740_v11, -inf }
 0x468   : > { %747 = vmax.xlane.f32.xlu0 %v746_v15 }
 0x4f5   : > { %v748_v16 = vpop.xlane.xlu0 %747 }
 0x4f6   : > { %v749_v17 = vsub.f32 %v740_v11, %v748_v16 }
 0x4f8   : > { %v750_v18 = vmul.f32 1.442695, %v749_v17 }
 0x4fa   : > { %1047 = vpow2.f32 %v750_v18 }
 0x504   : > { %v1048_v19 = vpop.eup %1047 }
 0x505   : > { %v752_v20 = vsel %vm745_vm4, %v1048_v19, 0.0 }
 0x506   : > { %753 = vadd.xlane.f32.xlu0 %v752_v20 }
 0x507   : > { %1064 = shalt.err (!%p1061_p7)
}
 0x508   : > { %s1065_s11 = scalar_lea.hbm %s1435_s5, 384 }
 0x509   : > { %p1066_p8 = scmp.ne.s32.totalorder %s1435_s5, %s1065_s11  ;;  %p1071_p11 = scmp.lt.u32.totalorder %s1065_s11, %s1435_s5 }
 0x50b   : > { %p1067_p9 = pnand %p1066_p8, %p127_p2 }
 0x50d   : > { %p1068_p10 = pneg %p1067_p9 }
 0x50f   : > { %p1073_p12 = pnand %p1071_p11, %p1068_p10 }
 0x511   : > { %1076 = shalt.err (!%p1073_p12)
}
 0x512   : > { %s1148_s17 = smov 128   ;;  %s1149_s23 = smov 8  }
 0x513   : > { %984 = dma.vmem_to_hbm [thread:$0]  (%p127_p2), %s784_s7, 384, %s1435_s5, [#allocation5], %s1148_s17, %s1148_s17, %s1149_s23  }
 0x514   : > { %s892_s8 = sshll.u32 %s1202_s22, 7  ;;  %s773_s9 = sshll.u32 %s212_s12, 4  ;;  %s1381_s9 = int_to_ptr.vmem [resolvable:$true] %s773_s9 }
 0x515   : > { %s1379_s13 = scalar_lea.hbm %s1434_s4, %s892_s8  ;;  %s760_s7 = scalar_lea.sflag [#allocation3], %s210_s30 }
 0x516   : > { %s1077_s14 = scalar_lea.vmem %s1381_s9, 128  ;;  %s1150_s15 = smov [#allocation2]  }
 0x517   : > { %p1078_p13 = scmp.ne.s32.totalorder %s1381_s9, %s1077_s14  ;;  %s1081_s16 = sshll.u32 %s1150_s15, 4  ;;  %s1082_s16 = int_to_ptr.vmem [resolvable:$false] %s1081_s16 }
 0x518   : > { %s1083_s17 = scalar_lea.vmem %s1082_s16, 256  ;;  %p1084_p3 = scmp.lt.s32.totalorder %s1381_s9, %s1082_s16 }
 0x519   : > { %p1079_p0 = pnand %p1078_p13, %p1221_p5  ;;  %p1085_p4 = scmp.lt.s32.totalorder %s1083_s17, %s1077_s14 }
 0x51b   : > { %p1080_p1 = pneg %p1079_p0  ;;  %p1086_p7 = por %p1085_p4, %p1084_p3 }
 0x51d   : > { %p1087_p8 = pnand %p1086_p7, %p1080_p1 }
 0x593   : > { %v754_v21 = vpop.xlane.xlu0 %753 }
 0x594   : > { %1049 = vlog2.f32 %v754_v21 }
 0x59e   : > { %v1050_v22 = vpop.eup %1049 }
 0x59f   : > { %v756_v23 = vmul.f32 0.6931472, %v1050_v22 }
 0x5a1   : > { %v757_v24 = vsub.f32 %v749_v17, %v756_v23 }
 0x5a3   : > { %758 = vst.msk [vmem:[%s212_s12] sm:$0xff] %vm745_vm4, %v757_v24 }
 0x5a4   : > { %1090 = shalt.err (!%p1087_p8)
}
 0x5a5   : > { %s1091_s30 = scalar_lea.hbm %s1379_s13, 128  ;;  %s1095_s23 = scalar_lea.hbm %s1434_s4, 512 }
 0x5a6   : > { %p1092_p9 = scmp.ne.s32.totalorder %s1379_s13, %s1091_s30  ;;  %p1096_p12 = scmp.lt.u32.totalorder %s1379_s13, %s1434_s4 }
 0x5a7   : > { %p1097_p13 = scmp.lt.u32.totalorder %s1095_s23, %s1091_s30  ;;  %p1099_p1 = scmp.lt.u32.totalorder %s1091_s30, %s1379_s13 }
 0x5a8   : > { %p1093_p10 = pnand %p1092_p9, %p1221_p5 }
 0x5a9   : > { %p1098_p0 = por %p1097_p13, %p1096_p12 }
 0x5aa   : > { %p1094_p11 = pneg %p1093_p10 }
 0x5ab   : > { %p1100_p3 = por %p1099_p1, %p1098_p0 }
 0x5ad   : > { %p1101_p4 = pnand %p1100_p3, %p1094_p11 }
 0x5af   : > { %1104 = shalt.err (!%p1101_p4)
}
 0x5b0   : > { %982 = dma.vmem_to_hbm [thread:$0]  (%p1221_p5), %s1381_s9, 128, %s1379_s13, %s760_s7  }
 0x5b1   : > { %1122 = dma.done.wait (%p127_p2), [#allocation5], 384  }
 0x5b2   : > { %1124 = vsyncadd (%p127_p2), [#allocation5], 4294966912 }
 0x5b3 PF: > { %p994_p7 = scmp.ge.s32.totalorder %s1143_s21, 2  ;;  %s802_s8 = sand.u32 1, %s1131_s18  }
 0x5b4   : > { %s803_s10 = scalar_lea.sflag [#allocation3], %s802_s8 }
 0x5b5   : > { %p989_p8 = pnand %p994_p7, %p1225_p6 }
 0x5b7   : > { %1126 = dma.done.wait (!%p989_p8), %s803_s10, 128  }
 0x5b8   : > { %1128 = vsyncadd (!%p989_p8), %s803_s10, 4294967168  ;;  %p17_p5 = scmp.ge.s32.totalorder %s1206_s24, 6   ;;  %s1438_s18 = smov %s1135_s19 }
 0x5b9   : > { %s1439_s19 = smov %s1139_s20  ;;  %s1440_s20 = smov %s1217_s27 }
 0x5ba   : > { %s1441_s21 = smov %s1206_s24  ;;  %19 = sbr.rel (!%p17_p5) target bundleno = 4 (0x4), region = 85 }
 0x5c1   :  { %808 = vsyncpa [#allocation3], 1 }
 0x5c2   :  { %810 = vsyncpa [#allocation3 + $0x1], 1 }
 0x5c3   :  { %811 = vsyncpa [#allocation5], 1 }

</bundles_post_ra>
